<compile_context>
chip_gen: v6e
topology: v6e:2x2x1
jax: 0.10.0
libtpu: 0.0.40
codegen_flags: <defaults>
</compile_context>

<pallas_src>
import jax
import jax.numpy as jnp
from jax.experimental import pallas as pl
from jax.experimental.pallas import tpu as pltpu

IN_F = 2       # Linear(2, 4) input features
MIDDLE = 4     # middle_num in MyNet
OUT_F = 1      # Linear(4, 1) output features

# Flat parameter vector layout (all f32, row-major like PyTorch):
W1_OFF = 0                          # w1: (MIDDLE, IN_F) -> 8 scalars
B1_OFF = W1_OFF + MIDDLE * IN_F     # b1: (MIDDLE,)      -> 4 scalars
W2_OFF = B1_OFF + MIDDLE            # w2: (OUT_F, MIDDLE)-> 4 scalars
B2_OFF = W2_OFF + OUT_F * MIDDLE    # b2: (OUT_F,)       -> 1 scalar
N_PARAMS = B2_OFF + OUT_F           # 17

DEFAULT_TILE_B = 8192               # lanes per grid step (multiple of 128)


def mlp_kernel(params_ref, xT_ref, oT_ref):
    # params_ref: SMEM (N_PARAMS,) f32
    # xT_ref:     VMEM (IN_F, TILE_B) f32  -- batch on the lane axis
    # oT_ref:     VMEM (OUT_F, TILE_B) f32 -- lane-dense output
    xT = xT_ref[...]                 # (IN_F, TILE_B)
    x0 = xT[0:1, :]                  # (1, TILE_B)
    x1 = xT[1:2, :]                  # (1, TILE_B)

    # Second-layer bias starts the accumulator.
    z = jnp.zeros_like(x0) + params_ref[B2_OFF]

    # Unrolled per-hidden-unit FMA chain (pure VPU work, no MXU).
    for j in range(MIDDLE):
        w1_j0 = params_ref[W1_OFF + j * IN_F + 0]
        w1_j1 = params_ref[W1_OFF + j * IN_F + 1]
        b1_j = params_ref[B1_OFF + j]
        h_j = jnp.maximum(w1_j0 * x0 + w1_j1 * x1 + b1_j, 0.0)
        z = z + params_ref[W2_OFF + j] * h_j

    # Sigmoid: exp issues on the EUP slot; exact reciprocal for the divide.
    e = jnp.exp(-z)
    oT_ref[...] = pl.reciprocal(1.0 + e, approx=False)


def _round_up(n, m):
    return ((n + m - 1) // m) * m


def mynet_forward(x, w1, b1, w2, b2, *, tile_b=DEFAULT_TILE_B):
    """x: (B, 2) f32; w1: (4, 2); b1: (4,); w2: (1, 4); b2: (1,)  (PyTorch Linear layout)."""
    B = x.shape[0]
    x = x.astype(jnp.float32)

    # All 17 parameters as one flat SMEM-resident scalar vector (no padded VMEM tiles,
    # no per-call weight DMAs beyond one tiny SMEM copy).
    params = jnp.concatenate([
        w1.reshape(-1).astype(jnp.float32),
        b1.reshape(-1).astype(jnp.float32),
        w2.reshape(-1).astype(jnp.float32),
        b2.reshape(-1).astype(jnp.float32),
    ])

    # Batch goes on the 128-lane axis: operate on x^T, padded to a tile multiple.
    tile = min(tile_b, _round_up(B, 128))
    b_pad = _round_up(B, tile)
    xT = jnp.zeros((IN_F, b_pad), jnp.float32).at[:, :B].set(x.T)
    num_tiles = b_pad // tile

    cost = pl.CostEstimate(
        flops=24 * b_pad,                          # 12 MACs per sample
        transcendentals=b_pad,                     # one exp per sample
        bytes_accessed=(IN_F + OUT_F) * 4 * b_pad  # read x^T, write y^T
    )

    yT = pl.pallas_call(
        mlp_kernel,
        grid=(num_tiles,),
        in_specs=[
            pl.BlockSpec(memory_space=pltpu.MemorySpace.SMEM),       # params (whole, SMEM)
            pl.BlockSpec((IN_F, tile), lambda i: (0, i)),            # x^T tile
        ],
        out_specs=pl.BlockSpec((OUT_F, tile), lambda i: (0, i)),     # y^T tile (lane-dense)
        out_shape=jax.ShapeDtypeStruct((OUT_F, b_pad), jnp.float32),
        compiler_params=pltpu.CompilerParams(
            dimension_semantics=("parallel",),
        ),
        cost_estimate=cost,
    )(params, xT)

    # Back to PyTorch layout (B, OUT_F); drop batch padding.
    return yT[:, :B].T


if __name__ == "__main__":
    key = jax.random.PRNGKey(0)
    kx, k1, k2, k3, k4 = jax.random.split(key, 5)

    B = 8
    x = jax.random.normal(kx, (B, IN_F), dtype=jnp.float32)

    # Deterministic parameter init (PyTorch Linear shapes: weight (out, in), bias (out,))
    w1 = jax.random.normal(k1, (MIDDLE, IN_F), dtype=jnp.float32) * 0.5
    b1 = jax.random.normal(k2, (MIDDLE,), dtype=jnp.float32) * 0.1
    w2 = jax.random.normal(k3, (OUT_F, MIDDLE), dtype=jnp.float32) * 0.5
    b2 = jax.random.normal(k4, (OUT_F,), dtype=jnp.float32) * 0.1

    y = mynet_forward(x, w1, b1, w2, b2)
    y = jax.block_until_ready(y)

    # Pure-JAX reference of the same forward pass
    h_ref = jnp.maximum(x @ w1.T + b1, 0.0)
    y_ref = jax.nn.sigmoid(h_ref @ w2.T + b2)

    assert y.shape == (B, OUT_F)
    assert jnp.allclose(y, y_ref, atol=1e-5, rtol=1e-5)
    print("KERNEL_OK")
</pallas_src>

<mosaic_0001>
module attributes {stable_mosaic.version = 11 : i64} {
  func.func @mlp_kernel(%arg0: i32, %arg1: memref<17xf32, #tpu.memory_space<smem>>, %arg2: memref<2x128xf32, #tpu.memory_space<vmem>>, %arg3: memref<1x128xf32, #tpu.memory_space<vmem>>) attributes {dimension_semantics = [#tpu.dimension_semantics<parallel>], iteration_bounds = array<i64: 1>, scalar_prefetch = 0 : i64, scratch_operands = 0 : i64, tpu.core_type = #tpu.core_type<tc>, window_params = [{transform_indices = @transform_0, window_bounds = array<i64: 17>}, {transform_indices = @transform_1, window_bounds = array<i64: 2, 128>}, {transform_indices = @transform_2, window_bounds = array<i64: 1, 128>}]} {
    %c0 = arith.constant 0 : index
    %c0_0 = arith.constant 0 : index
    %0 = vector.load %arg2[%c0, %c0_0] : memref<2x128xf32, #tpu.memory_space<vmem>>, vector<2x128xf32>
    %1 = vector.extract_strided_slice %0 {offsets = [0, 0], sizes = [1, 128], strides = [1, 1]} : vector<2x128xf32> to vector<1x128xf32>
    %2 = vector.extract_strided_slice %0 {offsets = [1, 0], sizes = [1, 128], strides = [1, 1]} : vector<2x128xf32> to vector<1x128xf32>
    %cst = arith.constant 0.000000e+00 : f32
    %3 = vector.broadcast %cst : f32 to vector<1x128xf32>
    %c16 = arith.constant 16 : index
    %4 = memref.load %arg1[%c16] : memref<17xf32, #tpu.memory_space<smem>>
    %5 = vector.broadcast %4 : f32 to vector<1x128xf32>
    %6 = arith.addf %3, %5 : vector<1x128xf32>
    %c0_1 = arith.constant 0 : index
    %7 = memref.load %arg1[%c0_1] : memref<17xf32, #tpu.memory_space<smem>>
    %c1 = arith.constant 1 : index
    %8 = memref.load %arg1[%c1] : memref<17xf32, #tpu.memory_space<smem>>
    %c8 = arith.constant 8 : index
    %9 = memref.load %arg1[%c8] : memref<17xf32, #tpu.memory_space<smem>>
    %10 = vector.broadcast %7 : f32 to vector<1x128xf32>
    %11 = arith.mulf %10, %1 : vector<1x128xf32>
    %12 = vector.broadcast %8 : f32 to vector<1x128xf32>
    %13 = arith.mulf %12, %2 : vector<1x128xf32>
    %14 = arith.addf %11, %13 : vector<1x128xf32>
    %15 = vector.broadcast %9 : f32 to vector<1x128xf32>
    %16 = arith.addf %14, %15 : vector<1x128xf32>
    %cst_2 = arith.constant 0.000000e+00 : f32
    %17 = vector.broadcast %cst_2 : f32 to vector<1x128xf32>
    %18 = arith.maximumf %16, %17 : vector<1x128xf32>
    %c12 = arith.constant 12 : index
    %19 = memref.load %arg1[%c12] : memref<17xf32, #tpu.memory_space<smem>>
    %20 = vector.broadcast %19 : f32 to vector<1x128xf32>
    %21 = arith.mulf %20, %18 : vector<1x128xf32>
    %22 = arith.addf %6, %21 : vector<1x128xf32>
    %c2 = arith.constant 2 : index
    %23 = memref.load %arg1[%c2] : memref<17xf32, #tpu.memory_space<smem>>
    %c3 = arith.constant 3 : index
    %24 = memref.load %arg1[%c3] : memref<17xf32, #tpu.memory_space<smem>>
    %c9 = arith.constant 9 : index
    %25 = memref.load %arg1[%c9] : memref<17xf32, #tpu.memory_space<smem>>
    %26 = vector.broadcast %23 : f32 to vector<1x128xf32>
    %27 = arith.mulf %26, %1 : vector<1x128xf32>
    %28 = vector.broadcast %24 : f32 to vector<1x128xf32>
    %29 = arith.mulf %28, %2 : vector<1x128xf32>
    %30 = arith.addf %27, %29 : vector<1x128xf32>
    %31 = vector.broadcast %25 : f32 to vector<1x128xf32>
    %32 = arith.addf %30, %31 : vector<1x128xf32>
    %cst_3 = arith.constant 0.000000e+00 : f32
    %33 = vector.broadcast %cst_3 : f32 to vector<1x128xf32>
    %34 = arith.maximumf %32, %33 : vector<1x128xf32>
    %c13 = arith.constant 13 : index
    %35 = memref.load %arg1[%c13] : memref<17xf32, #tpu.memory_space<smem>>
    %36 = vector.broadcast %35 : f32 to vector<1x128xf32>
    %37 = arith.mulf %36, %34 : vector<1x128xf32>
    %38 = arith.addf %22, %37 : vector<1x128xf32>
    %c4 = arith.constant 4 : index
    %39 = memref.load %arg1[%c4] : memref<17xf32, #tpu.memory_space<smem>>
    %c5 = arith.constant 5 : index
    %40 = memref.load %arg1[%c5] : memref<17xf32, #tpu.memory_space<smem>>
    %c10 = arith.constant 10 : index
    %41 = memref.load %arg1[%c10] : memref<17xf32, #tpu.memory_space<smem>>
    %42 = vector.broadcast %39 : f32 to vector<1x128xf32>
    %43 = arith.mulf %42, %1 : vector<1x128xf32>
    %44 = vector.broadcast %40 : f32 to vector<1x128xf32>
    %45 = arith.mulf %44, %2 : vector<1x128xf32>
    %46 = arith.addf %43, %45 : vector<1x128xf32>
    %47 = vector.broadcast %41 : f32 to vector<1x128xf32>
    %48 = arith.addf %46, %47 : vector<1x128xf32>
    %cst_4 = arith.constant 0.000000e+00 : f32
    %49 = vector.broadcast %cst_4 : f32 to vector<1x128xf32>
    %50 = arith.maximumf %48, %49 : vector<1x128xf32>
    %c14 = arith.constant 14 : index
    %51 = memref.load %arg1[%c14] : memref<17xf32, #tpu.memory_space<smem>>
    %52 = vector.broadcast %51 : f32 to vector<1x128xf32>
    %53 = arith.mulf %52, %50 : vector<1x128xf32>
    %54 = arith.addf %38, %53 : vector<1x128xf32>
    %c6 = arith.constant 6 : index
    %55 = memref.load %arg1[%c6] : memref<17xf32, #tpu.memory_space<smem>>
    %c7 = arith.constant 7 : index
    %56 = memref.load %arg1[%c7] : memref<17xf32, #tpu.memory_space<smem>>
    %c11 = arith.constant 11 : index
    %57 = memref.load %arg1[%c11] : memref<17xf32, #tpu.memory_space<smem>>
    %58 = vector.broadcast %55 : f32 to vector<1x128xf32>
    %59 = arith.mulf %58, %1 : vector<1x128xf32>
    %60 = vector.broadcast %56 : f32 to vector<1x128xf32>
    %61 = arith.mulf %60, %2 : vector<1x128xf32>
    %62 = arith.addf %59, %61 : vector<1x128xf32>
    %63 = vector.broadcast %57 : f32 to vector<1x128xf32>
    %64 = arith.addf %62, %63 : vector<1x128xf32>
    %cst_5 = arith.constant 0.000000e+00 : f32
    %65 = vector.broadcast %cst_5 : f32 to vector<1x128xf32>
    %66 = arith.maximumf %64, %65 : vector<1x128xf32>
    %c15 = arith.constant 15 : index
    %67 = memref.load %arg1[%c15] : memref<17xf32, #tpu.memory_space<smem>>
    %68 = vector.broadcast %67 : f32 to vector<1x128xf32>
    %69 = arith.mulf %68, %66 : vector<1x128xf32>
    %70 = arith.addf %54, %69 : vector<1x128xf32>
    %cst_6 = arith.constant 0.000000e+00 : f32
    %71 = vector.broadcast %cst_6 : f32 to vector<1x128xf32>
    %72 = arith.subf %71, %70 : vector<1x128xf32>
    %73 = math.exp %72 : vector<1x128xf32>
    %cst_7 = arith.constant 1.000000e+00 : f32
    %74 = vector.broadcast %cst_7 : f32 to vector<1x128xf32>
    %75 = arith.addf %74, %73 : vector<1x128xf32>
    %76 = tpu.reciprocal %75 : vector<1x128xf32> -> vector<1x128xf32>
    %c0_8 = arith.constant 0 : index
    %c0_9 = arith.constant 0 : index
    %77 = vector.load %arg3[%c0_8, %c0_9] : memref<1x128xf32, #tpu.memory_space<vmem>>, vector<1x128xf32>
    tpu.vector_store %arg3[%c0_8, %c0_9], %76 {strides = array<i32>} : memref<1x128xf32, #tpu.memory_space<vmem>>, vector<1x128xf32>,
    return
  }
  func.func @transform_0(%arg0: i32) -> i32 {
    %c0_i32 = arith.constant 0 : i32
    %c0_i32_0 = arith.constant 0 : i32
    return %c0_i32 : i32
  }
  func.func @transform_1(%arg0: i32) -> (i32, i32) {
    %c0_i32 = arith.constant 0 : i32
    %c0_i32_0 = arith.constant 0 : i32
    return %c0_i32, %arg0 : i32, i32
  }
  func.func @transform_2(%arg0: i32) -> (i32, i32) {
    %c0_i32 = arith.constant 0 : i32
    %c0_i32_0 = arith.constant 0 : i32
    return %c0_i32, %arg0 : i32, i32
  }
}

</mosaic_0001>

<bundles_post_ra>
// kernel: tpu_custom_call.1
= control target key start
LH: loop header
LB: loop body
LE: loop exit
PB: predicated region body
PF: predicated region fallthrough
CT: control target
= control target key end

     0   :  { %7 = vsyncpa [#allocation5], 0  ;;  %s252_s0 = inlined_call_operand.hbm [shape: f32[17], index: 0, kind: input, shape index: {}]   ;;  %s253_s1 = inlined_call_operand.hbm [shape: f32[2,128], index: 1, kind: input, shape index: {}]   ;;  %s254_s2 = inlined_call_operand.hbm [shape: f32[1,128], index: 2, kind: output, shape index: {}]  }
   0x1   :  { %8 = vsyncpa [#allocation3], 0 }
   0x2   :  { %9 = vsyncpa [#allocation4], 0  ;;  %s210_s9 = smov [#allocation2]   ;;  %s211_s12 = smov [#allocation6]  }
   0x3   :  { %17 = dma.hbm_to_smem %s252_s0, 16, %s210_s9, [#allocation5]  }
   0x4   :  { %s24_s13 = sshll.u32 %s211_s12, 4  ;;  %s25_s13 = int_to_ptr.vmem [resolvable:$true] %s24_s13 }
   0x5   :  { %s172_s14 = scalar_lea.vmem %s25_s13, 32  ;;  %p177_p1 = scmp.lt.s32.totalorder %s25_s13, %s25_s13 }
   0x6   :  { %p173_p0 = scmp.ne.s32.totalorder %s25_s13, %s172_s14  ;;  %p178_p2 = scmp.lt.s32.totalorder %s172_s14, %s172_s14 }
   0x8   :  { %p179_p3 = por %p178_p2, %p177_p1 }
   0xa   :  { %p180_p4 = pnand %p179_p3, %p173_p0 }
   0xc   :  { %183 = shalt.err (!%p180_p4)
}
   0xd   :  { %27 = dma.hbm_to_vmem [thread:$0]  %s253_s1, 32, %s25_s13, [#allocation3]  }
   0xe   :  { %204 = dma.done.wait [#allocation5], 16  }
   0xf   :  { %205 = vsyncadd [#allocation5], 4294967280 }
  0x10   :  { %206 = dma.done.wait [#allocation3], 32  }
  0x11   :  { %207 = vsyncadd [#allocation3], 4294967264 }
  0x12   :  { %34 = sfence }
  0x13   :  { %s39_s0 = sld [smem:[#allocation2]]  ;;  %v35_v0 = vld [vmem:[#allocation6] sm:$0x3]  ;;  %s212_s4 = smov [#allocation7]  }
  0x14   :  { %s134_s17 = sld [smem:[#allocation2 + $0x1]]  ;;  %s123_s5 = sshll.u32 %s212_s4, 4  ;;  %s124_s5 = int_to_ptr.vmem [resolvable:$true] %s123_s5 }
  0x15   :  { %s234_s18 = sld [smem:[#allocation2 + $0x10]]  ;;  %s184_s6 = scalar_lea.vmem %s124_s5, 16 }
  0x16   :  { %s135_s19 = sld [smem:[#allocation2 + $0x8]]  ;;  %p185_p5 = scmp.ne.s32.totalorder %s124_s5, %s184_s6 }
  0x17   :  { %s137_s20 = sld [smem:[#allocation2 + $0x2]]  ;;  %s188_s7 = scalar_lea.vmem %s124_s5, 32 }
  0x18   :  { %s138_s21 = sld [smem:[#allocation2 + $0x3]]  ;;  %p189_p6 = scmp.lt.s32.totalorder %s124_s5, %s124_s5 }
  0x19   :  { %v42_v1 = vstv %s39_s0  ;;  %s236_s22 = sld [smem:[#allocation2 + $0xc]]  ;;  %p190_p7 = scmp.lt.s32.totalorder %s188_s7, %s184_s6 }
  0x1a   :  { %v44_v2 = vstv %s134_s17  ;;  %s139_s23 = sld [smem:[#allocation2 + $0x9]]  ;;  %v43_v3 = vmul.f32 %v42_v1, %v35_v0 }
  0x1b   :  { %v45_v4 = vmul.f32 %v44_v2, %v35_v0  ;;  %s141_s1 = sld [smem:[#allocation2 + $0x4]]  ;;  %v37_v22 = vstv %s234_s18  ;;  %p191_p8 = por %p190_p7, %p189_p6 }
  0x1c   :  { %s142_s24 = sld [smem:[#allocation2 + $0x5]]  ;;  %v50_v7 = vstv %s135_s19 }
  0x1d   :  { %v47_v5 = vrot.slane %v45_v4, 1  ;;  %v60_v6 = vstv %s137_s20  ;;  %s238_s25 = sld [smem:[#allocation2 + $0xd]]  ;;  %p192_p9 = pnand %p191_p8, %p185_p5 }
  0x1e   :  { %v62_v8 = vstv %s138_s21  ;;  %s240_s26 = sld [smem:[#allocation2 + $0xa]]  ;;  %v61_v10 = vmul.f32 %v60_v6, %v35_v0 }
  0x1f   :  { %v49_v9 = vadd.f32 %v47_v5, %v43_v3  ;;  %v63_v11 = vmul.f32 %v62_v8, %v35_v0  ;;  %s145_s27 = sld [smem:[#allocation2 + $0x6]]  ;;  %v54_v15 = vstv %s236_s22 }
  0x20   :  { %s146_s28 = sld [smem:[#allocation2 + $0x7]]  ;;  %v68_v16 = vstv %s139_s23 }
  0x21   :  { %v51_v12 = vadd.f32 %v50_v7, %v49_v9  ;;  %v65_v13 = vrot.slane %v63_v11, 1  ;;  %v78_v14 = vstv %s141_s1  ;;  %s242_s29 = sld [smem:[#allocation2 + $0xe]] }
  0x22   :  { %v80_v17 = vstv %s142_s24  ;;  %s147_s30 = sld [smem:[#allocation2 + $0xb]]  ;;  %v79_v20 = vmul.f32 %v78_v14, %v35_v0 }
  0x23   :  { %v52_v18 = vmax.f32 %v51_v12, 0.0  ;;  %v67_v19 = vadd.f32 %v65_v13, %v61_v10  ;;  %v81_v21 = vmul.f32 %v80_v17, %v35_v0  ;;  %v72_v27 = vstv %s238_s25  ;;  %s148_s3 = sld [smem:[#allocation2 + $0xf]] }
  0x24   :  { %v86_v28 = vstv %s240_s26 }
  0x25   :  { %v55_v23 = vmul.f32 %v54_v15, %v52_v18  ;;  %v69_v24 = vadd.f32 %v68_v16, %v67_v19  ;;  %v83_v25 = vrot.slane %v81_v21, 1  ;;  %v96_v26 = vstv %s145_s27 }
  0x26   :  { %v97_v29 = vmul.f32 %v96_v26, %v35_v0  ;;  %v98_v30 = vstv %s146_s28 }
  0x27   :  { %v56_v31 = vadd.f32 %v55_v23, %v37_v22  ;;  %v70_v32 = vmax.f32 %v69_v24, 0.0  ;;  %v85_v33 = vadd.f32 %v83_v25, %v79_v20  ;;  %v99_v34 = vmul.f32 %v98_v30, %v35_v0 }
  0x28   :  { %v90_v38 = vstv %s242_s29  ;;  %v104_v39 = vstv %s147_s30 }
  0x29   :  { %v73_v35 = vmul.f32 %v72_v27, %v70_v32  ;;  %v87_v36 = vadd.f32 %v86_v28, %v85_v33  ;;  %v101_v37 = vrot.slane %v99_v34, 1  ;;  %v108_v45 = vstv %s148_s3 }
  0x2b   :  { %v74_v40 = vadd.f32 %v73_v35, %v56_v31  ;;  %v88_v41 = vmax.f32 %v87_v36, 0.0  ;;  %v103_v42 = vadd.f32 %v101_v37, %v97_v29 }
  0x2d   :  { %v91_v43 = vmul.f32 %v90_v38, %v88_v41  ;;  %v105_v44 = vadd.f32 %v104_v39, %v103_v42 }
  0x2f   :  { %v92_v46 = vadd.f32 %v91_v43, %v74_v40  ;;  %v106_v47 = vmax.f32 %v105_v44, 0.0 }
  0x31   :  { %v109_v48 = vmul.f32 %v108_v45, %v106_v47 }
  0x33   :  { %v110_v49 = vadd.f32 %v109_v48, %v92_v46 }
  0x35   :  { %v111_v50 = vsub.f32 0.0, %v110_v49 }
  0x37   :  { %v112_v51 = vmul.f32 1.442695, %v111_v50 }
  0x39   :  { %152 = vpow2.f32 %v112_v51 }
  0x46   :  { %v153_v52 = vpop.eup %152 }
  0x47   :  { %v114_v53 = vadd.f32 1.0, %v153_v52 }
  0x49   :  { %154 = vrcp.f32 %v114_v53 }
  0x56   :  { %v155_v54 = vpop.eup %154 }
  0x57   :  { %116 = vst [vmem:[#allocation7] sm:$0x1] %v155_v54 }
  0x58   :  { %195 = shalt.err (!%p192_p9)
}
  0x59   :  { %126 = dma.vmem_to_hbm [thread:$0]  %s124_s5, 16, %s254_s2, [#allocation4]  }
  0x5a   :  { %208 = dma.done.wait [#allocation4], 16  }
  0x5b   :  { %209 = vsyncadd [#allocation4], 4294967280 }
  0x5c   :  { %130 = vsyncpa [#allocation3], 1 }
  0x5d   :  { %131 = vsyncpa [#allocation4], 1 }
  0x5e   :  { %132 = vsyncpa [#allocation5], 1 }

</bundles_post_ra>
